<compile_context>
chip_gen: v6e
topology: v6e:2x2x1
jax: 0.10.0
libtpu: 0.0.40
codegen_flags: <defaults>
</compile_context>

<pallas_src>
import jax
import jax.numpy as jnp
from jax import lax
from jax.experimental import pallas as pl
from jax.experimental.pallas import tpu as pltpu


def _norm_reg_l1_kernel(ind_ref,      # VMEM (1, 1, M)  int32  gather indices
                        feat_ref,     # VMEM (1, C, HW) native feature dtype
                        mask_ref,     # VMEM (1, 1, M)  f32
                        target_ref,   # VMEM (1, C, M)  f32
                        loss_ref,     # VMEM (1, 1, 1)  f32  per-batch |.| sum
                        cnt_ref):     # VMEM (1, 1, 1)  f32  per-batch expanded-mask count
    C = feat_ref.shape[1]
    HW = feat_ref.shape[2]
    M = ind_ref.shape[2]

    # Clamp so an out-of-range index can never read outside the VMEM tile.
    ids = jnp.clip(ind_ref[0], 0, HW - 1)                              # (1, M) int32

    # In-VMEM gather via one-hot MXU matmul: pred[c, m] = feat[c, ids[m]].
    hw_iota = lax.broadcasted_iota(jnp.int32, (HW, M), 0)              # (HW, M)
    onehot = (hw_iota == ids).astype(jnp.float32)                      # (HW, M)
    feat = feat_ref[0].astype(jnp.float32)                             # (C, HW)
    pred = jnp.dot(feat, onehot, preferred_element_type=jnp.float32)   # (C, M)

    msk = mask_ref[0]                                                  # (1, M)
    tgt = target_ref[0]                                                # (C, M)

    pred_n = pred / (tgt + 1e-4)
    diff = msk * jnp.abs(pred_n - 1.0)                                 # (C, M), lane-dense

    loss_ref[...] = jnp.sum(diff).reshape(1, 1, 1)
    # mask is expanded over C before .sum() in the PyTorch reference.
    cnt_ref[...] = (jnp.sum(msk) * C).reshape(1, 1, 1)


@jax.jit
def norm_reg_l1_loss(output, mask, ind, target):
    """output: (B, C, H, W); mask: (B, M); ind: (B, M) int; target: (B, M, C)."""
    B, C, H, W = output.shape
    M = ind.shape[1]
    HW = H * W

    feat = output.reshape(B, C, HW)                                  # free reshape, native layout
    ind3 = ind.astype(jnp.int32).reshape(B, 1, M)                    # lane-dense indices
    mask3 = mask.astype(jnp.float32).reshape(B, 1, M)                # lane-dense mask
    target3 = jnp.transpose(target.astype(jnp.float32), (0, 2, 1))   # (B, C, M), lane-dense

    loss_part, cnt_part = pl.pallas_call(
        _norm_reg_l1_kernel,
        out_shape=(jax.ShapeDtypeStruct((B, 1, 1), jnp.float32),
                   jax.ShapeDtypeStruct((B, 1, 1), jnp.float32)),
        grid_spec=pltpu.PrefetchScalarGridSpec(
            num_scalar_prefetch=0,
            grid=(B,),
            in_specs=[
                pl.BlockSpec((1, 1, M), lambda b: (b, 0, 0)),        # ind
                pl.BlockSpec((1, C, HW), lambda b: (b, 0, 0)),       # feat (streamed / double-buffered)
                pl.BlockSpec((1, 1, M), lambda b: (b, 0, 0)),        # mask
                pl.BlockSpec((1, C, M), lambda b: (b, 0, 0)),        # target
            ],
            out_specs=(pl.BlockSpec((1, 1, 1), lambda b: (b, 0, 0)),
                       pl.BlockSpec((1, 1, 1), lambda b: (b, 0, 0))),
        ),
        compiler_params=pltpu.CompilerParams(
            dimension_semantics=("parallel",),     # per-batch outputs -> safe megacore split on v7x
            vmem_limit_bytes=32 * 1024 * 1024,
        ),
    )(ind3, feat, mask3, target3)

    # Final global normalize (tiny B-element reductions) in the wrapper.
    return jnp.sum(loss_part) / (jnp.sum(cnt_part) + 1e-4)


def norm_reg_l1_loss_ref(output, mask, ind, target):
    """Pure-JAX reference mirroring the PyTorch NormRegL1Loss module."""
    B, C, H, W = output.shape
    feat = jnp.transpose(output, (0, 2, 3, 1)).reshape(B, H * W, C)
    pred = jnp.take_along_axis(feat, ind.astype(jnp.int32)[:, :, None], axis=1)  # (B, M, C)
    m = jnp.broadcast_to(mask.astype(jnp.float32)[:, :, None], pred.shape)
    pred_n = pred / (target + 1e-4)
    ones = jnp.ones_like(target)
    loss = jnp.sum(jnp.abs(pred_n * m - ones * m))
    return loss / (jnp.sum(m) + 1e-4)


if __name__ == "__main__":
    key = jax.random.PRNGKey(0)
    k1, k2, k3, k4 = jax.random.split(key, 4)

    B, C, H, W, M = 2, 4, 16, 16, 8
    output = jax.random.normal(k1, (B, C, H, W), dtype=jnp.float32)
    target = jax.random.uniform(k2, (B, M, C), dtype=jnp.float32,
                                minval=0.5, maxval=2.0)
    ind = jax.random.randint(k3, (B, M), 0, H * W, dtype=jnp.int32)
    mask = (jax.random.uniform(k4, (B, M)) > 0.3).astype(jnp.float32)

    loss = jax.block_until_ready(norm_reg_l1_loss(output, mask, ind, target))
    ref = jax.block_until_ready(norm_reg_l1_loss_ref(output, mask, ind, target))
    assert jnp.allclose(loss, ref, rtol=1e-5, atol=1e-5), (loss, ref)

    print("KERNEL_OK")
</pallas_src>

<mosaic_0001>
module attributes {stable_mosaic.version = 11 : i64} {
  func.func @_norm_reg_l1_kernel(%arg0: i32, %arg1: memref<1x1x8xi32, #tpu.memory_space<vmem>>, %arg2: memref<1x4x256xf32, #tpu.memory_space<vmem>>, %arg3: memref<1x1x8xf32, #tpu.memory_space<vmem>>, %arg4: memref<1x4x8xf32, #tpu.memory_space<vmem>>, %arg5: memref<1x1x1xf32, #tpu.memory_space<vmem>>, %arg6: memref<1x1x1xf32, #tpu.memory_space<vmem>>) attributes {dimension_semantics = [#tpu.dimension_semantics<parallel>], iteration_bounds = array<i64: 2>, scalar_prefetch = 0 : i64, scratch_operands = 0 : i64, tpu.core_type = #tpu.core_type<tc>, window_params = [{transform_indices = @transform_0, window_bounds = array<i64: 1, 1, 8>}, {transform_indices = @transform_1, window_bounds = array<i64: 1, 4, 256>}, {transform_indices = @transform_2, window_bounds = array<i64: 1, 1, 8>}, {transform_indices = @transform_3, window_bounds = array<i64: 1, 4, 8>}, {transform_indices = @transform_4, window_bounds = array<i64: 1, 1, 1>}, {transform_indices = @transform_5, window_bounds = array<i64: 1, 1, 1>}]} {
    %c0 = arith.constant 0 : index
    %c0_0 = arith.constant 0 : index
    %c0_1 = arith.constant 0 : index
    %0 = vector.load %arg1[%c0, %c0_0, %c0_1] : memref<1x1x8xi32, #tpu.memory_space<vmem>>, vector<1x1x8xi32>
    %1 = vector.shape_cast %0 : vector<1x1x8xi32> to vector<1x8xi32>
    %c0_i32 = arith.constant 0 : i32
    %c255_i32 = arith.constant 255 : i32
    %2 = vector.broadcast %c0_i32 : i32 to vector<1x8xi32>
    %3 = arith.maxsi %2, %1 : vector<1x8xi32>
    %4 = vector.broadcast %c255_i32 : i32 to vector<1x8xi32>
    %5 = arith.minsi %4, %3 : vector<1x8xi32>
    %6 = tpu.iota {dimensions = array<i32: 0>} : vector<256x8xi32>
    %7 = vector.broadcast %5 : vector<1x8xi32> to vector<256x8xi32>
    %8 = arith.cmpi eq, %6, %7 : vector<256x8xi32>
    %9 = arith.extui %8 : vector<256x8xi1> to vector<256x8xi32>
    %10 = arith.sitofp %9 : vector<256x8xi32> to vector<256x8xf32>
    %c0_2 = arith.constant 0 : index
    %c0_3 = arith.constant 0 : index
    %c0_4 = arith.constant 0 : index
    %11 = vector.load %arg2[%c0_2, %c0_3, %c0_4] : memref<1x4x256xf32, #tpu.memory_space<vmem>>, vector<1x4x256xf32>
    %12 = vector.shape_cast %11 : vector<1x4x256xf32> to vector<4x256xf32>
    %cst = arith.constant dense<0.000000e+00> : vector<4x8xf32>
    %13 = tpu.matmul %12, %10, %cst {dimension_numbers = #tpu.dot_dimension_numbers<[1], [0], [0], [1], [0, 0, 1, 1], [], []>} : vector<4x256xf32>, vector<256x8xf32>, vector<4x8xf32> -> vector<4x8xf32>
    %c0_5 = arith.constant 0 : index
    %c0_6 = arith.constant 0 : index
    %c0_7 = arith.constant 0 : index
    %14 = vector.load %arg3[%c0_5, %c0_6, %c0_7] : memref<1x1x8xf32, #tpu.memory_space<vmem>>, vector<1x1x8xf32>
    %15 = vector.shape_cast %14 : vector<1x1x8xf32> to vector<1x8xf32>
    %c0_8 = arith.constant 0 : index
    %c0_9 = arith.constant 0 : index
    %c0_10 = arith.constant 0 : index
    %16 = vector.load %arg4[%c0_8, %c0_9, %c0_10] : memref<1x4x8xf32, #tpu.memory_space<vmem>>, vector<1x4x8xf32>
    %17 = vector.shape_cast %16 : vector<1x4x8xf32> to vector<4x8xf32>
    %cst_11 = arith.constant 9.99999974E-5 : f32
    %18 = vector.broadcast %cst_11 : f32 to vector<4x8xf32>
    %19 = arith.addf %17, %18 : vector<4x8xf32>
    %20 = arith.divf %13, %19 : vector<4x8xf32>
    %cst_12 = arith.constant 1.000000e+00 : f32
    %21 = vector.broadcast %cst_12 : f32 to vector<4x8xf32>
    %22 = arith.subf %20, %21 : vector<4x8xf32>
    %23 = math.absf %22 : vector<4x8xf32>
    %24 = vector.broadcast %15 : vector<1x8xf32> to vector<4x8xf32>
    %25 = arith.mulf %24, %23 : vector<4x8xf32>
    %26 = vector.shape_cast %25 : vector<4x8xf32> to vector<1x4x8xf32>
    %cst_13 = arith.constant dense<0.000000e+00> : vector<1xf32>
    %27 = vector.multi_reduction <add>, %26, %cst_13 [1, 2] : vector<1x4x8xf32> to vector<1xf32>
    %28 = vector.shape_cast %27 : vector<1xf32> to vector<1x1x1xf32>
    %29 = vector.extract %28[0, 0, 0] : f32 from vector<1x1x1xf32>
    %30 = vector.broadcast %29 : f32 to vector<1x1x1xf32>
    %c0_14 = arith.constant 0 : index
    %c0_15 = arith.constant 0 : index
    %c0_16 = arith.constant 0 : index
    %31 = vector.load %arg5[%c0_14, %c0_15, %c0_16] : memref<1x1x1xf32, #tpu.memory_space<vmem>>, vector<1x1x1xf32>
    tpu.vector_store %arg5[%c0_14, %c0_15, %c0_16], %30 {strides = array<i32>} : memref<1x1x1xf32, #tpu.memory_space<vmem>>, vector<1x1x1xf32>,
    %32 = vector.shape_cast %15 : vector<1x8xf32> to vector<1x1x8xf32>
    %cst_17 = arith.constant dense<0.000000e+00> : vector<1xf32>
    %33 = vector.multi_reduction <add>, %32, %cst_17 [1, 2] : vector<1x1x8xf32> to vector<1xf32>
    %34 = vector.shape_cast %33 : vector<1xf32> to vector<1x1x1xf32>
    %35 = vector.extract %34[0, 0, 0] : f32 from vector<1x1x1xf32>
    %cst_18 = arith.constant 4.000000e+00 : f32
    %36 = arith.mulf %35, %cst_18 : f32
    %37 = vector.broadcast %36 : f32 to vector<1x1x1xf32>
    %c0_19 = arith.constant 0 : index
    %c0_20 = arith.constant 0 : index
    %c0_21 = arith.constant 0 : index
    %38 = vector.load %arg6[%c0_19, %c0_20, %c0_21] : memref<1x1x1xf32, #tpu.memory_space<vmem>>, vector<1x1x1xf32>
    tpu.vector_store %arg6[%c0_19, %c0_20, %c0_21], %37 {strides = array<i32>} : memref<1x1x1xf32, #tpu.memory_space<vmem>>, vector<1x1x1xf32>,
    return
  }
  func.func @transform_0(%arg0: i32) -> (i32, i32, i32) {
    %c0_i32 = arith.constant 0 : i32
    %c0_i32_0 = arith.constant 0 : i32
    %c0_i32_1 = arith.constant 0 : i32
    return %arg0, %c0_i32, %c0_i32_0 : i32, i32, i32
  }
  func.func @transform_1(%arg0: i32) -> (i32, i32, i32) {
    %c0_i32 = arith.constant 0 : i32
    %c0_i32_0 = arith.constant 0 : i32
    %c0_i32_1 = arith.constant 0 : i32
    return %arg0, %c0_i32, %c0_i32_0 : i32, i32, i32
  }
  func.func @transform_2(%arg0: i32) -> (i32, i32, i32) {
    %c0_i32 = arith.constant 0 : i32
    %c0_i32_0 = arith.constant 0 : i32
    %c0_i32_1 = arith.constant 0 : i32
    return %arg0, %c0_i32, %c0_i32_0 : i32, i32, i32
  }
  func.func @transform_3(%arg0: i32) -> (i32, i32, i32) {
    %c0_i32 = arith.constant 0 : i32
    %c0_i32_0 = arith.constant 0 : i32
    %c0_i32_1 = arith.constant 0 : i32
    return %arg0, %c0_i32, %c0_i32_0 : i32, i32, i32
  }
  func.func @transform_4(%arg0: i32) -> (i32, i32, i32) {
    %c0_i32 = arith.constant 0 : i32
    %c0_i32_0 = arith.constant 0 : i32
    %c0_i32_1 = arith.constant 0 : i32
    return %arg0, %c0_i32, %c0_i32_0 : i32, i32, i32
  }
  func.func @transform_5(%arg0: i32) -> (i32, i32, i32) {
    %c0_i32 = arith.constant 0 : i32
    %c0_i32_0 = arith.constant 0 : i32
    %c0_i32_1 = arith.constant 0 : i32
    return %arg0, %c0_i32, %c0_i32_0 : i32, i32, i32
  }
}

</mosaic_0001>

<bundles_post_ra>
// kernel: norm_reg_l1_loss.1
= control target key start
LH: loop header
LB: loop body
LE: loop exit
PB: predicated region body
PF: predicated region fallthrough
CT: control target
= control target key end

     0   :  { %s797_s18 = smov 0   ;;  %s944_s0 = inlined_call_operand.vmem [shape: s32[2,1,8], index: 0, kind: input, shape index: {}]   ;;  %s945_s1 = inlined_call_operand.vmem [shape: f32[2,4,256], index: 1, kind: input, shape index: {}]   ;;  %s946_s2 = inlined_call_operand.vmem [shape: f32[2,1,8], index: 2, kind: input, shape index: {}]   ;;  %s947_s3 = inlined_call_operand.vmem [shape: f32[2,4,8], index: 3, kind: input, shape index: {}]   ;;  %s948_s4 = inlined_call_operand.vmem [shape: f32[2,1,1], index: 4, kind: output, shape index: {0}]   ;;  %s949_s5 = inlined_call_operand.vmem [shape: f32[2,1,1], index: 5, kind: output, shape index: {1}]  }
   0x1 LB: > { %s631_s19 = sadd.s32 4294967295, %s764_s18   ;;  %p635_p0 = scmp.ge.s32.totalorder %s764_s18, 1  ;;  %s764_s18 = sphi %s797_s18, %s16_s18  }
   0x2   : > { %p215_p1 = scmp.lt.s32.totalorder %s764_s18, 3 }
   0x4   : > { %p216_p2 = pnand %p635_p0, %p215_p1 }
   0x5   : > { %p254_p3 = scmp.lt.s32.totalorder (!%p216_p2), %s631_s19, 1 }
   0x6   : > { %219 = sbr.rel (%p216_p2) target bundleno = 467 (0x1d3), region = 36 }
   0xb   : > { %v280_v0 = vlaneseq  ;;  %s951_s19 = smov (!%p254_p3, %s631_s19), 1  ;;  %v766_v14 = vmov 1.0  }
   0xc   : > { %s256_s22 = scalar_lea.vmem %s944_s0, %s951_s19  ;;  %s706_s23 = sshll.u32 %s951_s19, 3 }
   0xd   : > { %v807_v1 = vshrl.u32 %v280_v0, 7  ;;  %v275_v2 = vld [vmem:[%s256_s22] sm:$0x1]  ;;  %s261_s26 = scalar_lea.vmem %s945_s1, %s706_s23  ;;  %s638_s27 = sshll.u32 %s951_s19, 2 }
   0xe   : > { %vm276_vm0 = vcmp.gt.s32.totalorder %v275_v2, 0  ;;  %v847_v20 = vld [vmem:[%s261_s26] sm:$0xff]  ;;  %s268_s30 = scalar_lea.vmem %s947_s3, %s638_s27  ;;  %s264_s8 = scalar_lea.vmem %s946_s2, %s951_s19 }
   0xf   : > { %v315_v3 = vsub.s32 0, %v807_v1  ;;  %v277_v4 = vsel %vm276_vm0, %v275_v2, 0  ;;  %v312_v5 = vadd.s32 248, %v807_v1  ;;  %v296_v6 = vadd.s32 120, %v807_v1  ;;  %v488_v41 = vld [vmem:[%s268_s30] sm:$0xf]  ;;  %s271_s11 = scalar_lea.vmem %s948_s4, %s951_s19  ;;  %s274_s16 = scalar_lea.vmem %s949_s5, %s951_s19 }
  0x10   : > { %vm278_vm1 = vcmp.lt.s32.totalorder %v277_v4, 255  ;;  %v311_v7 = vadd.s32 240, %v807_v1  ;;  %v295_v9 = vadd.s32 112, %v807_v1  ;;  %v310_v11 = vadd.s32 232, %v807_v1  ;;  %v487_v47 = vld [vmem:[%s264_s8] sm:$0x1] }
  0x11   : > { %v279_v8 = vsel %vm278_vm1, %v277_v4, 255  ;;  %v294_v12 = vadd.s32 104, %v807_v1  ;;  %v309_v13 = vadd.s32 224, %v807_v1  ;;  %v293_v15 = vadd.s32 96, %v807_v1 }
  0x12   : > { %v820_v10 = vrot.slane %v279_v8, %v315_v3  ;;  %v308_v16 = vadd.s32 216, %v807_v1  ;;  %v292_v17 = vadd.s32 88, %v807_v1  ;;  %v307_v18 = vadd.s32 208, %v807_v1 }
  0x13   : > { %v291_v19 = vadd.s32 80, %v807_v1  ;;  %v306_v21 = vadd.s32 200, %v807_v1  ;;  %v290_v22 = vadd.s32 72, %v807_v1  ;;  %v305_v23 = vadd.s32 192, %v807_v1 }
  0x14   : > { %vm348_vm2 = vcmp.eq.s32.totalorder %v312_v5, %v820_v10  ;;  %vm332_vm3 = vcmp.eq.s32.totalorder %v296_v6, %v820_v10  ;;  %vm347_vm4 = vcmp.eq.s32.totalorder %v311_v7, %v820_v10  ;;  %vm331_vm5 = vcmp.eq.s32.totalorder %v295_v9, %v820_v10 }
  0x15   : > { %707 = vmatprep.subr.msk.mxu0 %vm348_vm2, %v766_v14  ;;  %vm346_vm6 = vcmp.eq.s32.totalorder %v310_v11, %v820_v10  ;;  %vm330_vm7 = vcmp.eq.s32.totalorder %v294_v12, %v820_v10  ;;  %vm345_vm8 = vcmp.eq.s32.totalorder %v309_v13, %v820_v10  ;;  %vm329_vm9 = vcmp.eq.s32.totalorder %v293_v15, %v820_v10 }
  0x16   : > { %708 = vmatpush3.msk.msra.mxu0 %vm332_vm3, %v766_v14  ;;  %vm344_vm10 = vcmp.eq.s32.totalorder %v308_v16, %v820_v10  ;;  %vm328_vm11 = vcmp.eq.s32.totalorder %v292_v17, %v820_v10  ;;  %vm343_vm12 = vcmp.eq.s32.totalorder %v307_v18, %v820_v10  ;;  %v415_v24 = vcombine.high %v847_v20, %v847_v20 }
  0x17   : > { %709 = vmatprep.subr.msk.mxu0 %vm347_vm4, %v766_v14  ;;  %vm327_vm13 = vcmp.eq.s32.totalorder %v291_v19, %v820_v10  ;;  %v289_v25 = vadd.s32 64, %v807_v1  ;;  %vm342_vm14 = vcmp.eq.s32.totalorder %v306_v21, %v820_v10  ;;  %v304_v26 = vadd.s32 184, %v807_v1 }
  0x18   : > { %710 = vmatpush3.msk.msra.mxu0 %vm331_vm5, %v766_v14  ;;  %481 = vmatprep.mubr.f32.mxu0 %v415_v24  ;;  %vm326_vm15 = vcmp.eq.s32.totalorder %v290_v22, %v820_v10  ;;  %v288_v27 = vadd.s32 56, %v807_v1  ;;  %vm341_vm0 = vcmp.eq.s32.totalorder %v305_v23, %v820_v10  ;;  %v303_v28 = vadd.s32 176, %v807_v1 }
  0x19   : > { %711 = vmatprep.subr.msk.mxu0 %vm346_vm6, %v766_v14  ;;  %vm325_vm1 = vcmp.eq.s32.totalorder %v289_v25, %v820_v10  ;;  %v287_v29 = vadd.s32 48, %v807_v1  ;;  %vm340_vm2 = vcmp.eq.s32.totalorder %v304_v26, %v820_v10  ;;  %v302_v30 = vadd.s32 168, %v807_v1 }
  0x1a   : > { %712 = vmatpush3.msk.msra.mxu0 %vm330_vm7, %v766_v14  ;;  %vm324_vm3 = vcmp.eq.s32.totalorder %v288_v27, %v820_v10  ;;  %v286_v31 = vadd.s32 40, %v807_v1  ;;  %vm339_vm4 = vcmp.eq.s32.totalorder %v303_v28, %v820_v10  ;;  %v301_v32 = vadd.s32 160, %v807_v1 }
  0x1b   : > { %713 = vmatprep.subr.msk.mxu0 %vm345_vm8, %v766_v14  ;;  %vm323_vm5 = vcmp.eq.s32.totalorder %v287_v29, %v820_v10  ;;  %v285_v33 = vadd.s32 32, %v807_v1  ;;  %vm338_vm6 = vcmp.eq.s32.totalorder %v302_v30, %v820_v10  ;;  %v300_v34 = vadd.s32 152, %v807_v1 }
  0x1c   : > { %714 = vmatpush3.msk.msra.mxu0 %vm329_vm9, %v766_v14  ;;  %vm322_vm7 = vcmp.eq.s32.totalorder %v286_v31, %v820_v10  ;;  %v284_v35 = vadd.s32 24, %v807_v1  ;;  %vm337_vm8 = vcmp.eq.s32.totalorder %v301_v32, %v820_v10  ;;  %v299_v36 = vadd.s32 144, %v807_v1 }
  0x1d   : > { %715 = vmatprep.subr.msk.mxu0 %vm344_vm10, %v766_v14  ;;  %vm321_vm9 = vcmp.eq.s32.totalorder %v285_v33, %v820_v10  ;;  %v283_v37 = vadd.s32 16, %v807_v1  ;;  %vm336_vm10 = vcmp.eq.s32.totalorder %v300_v34, %v820_v10  ;;  %v298_v38 = vadd.s32 136, %v807_v1 }
  0x1e   : > { %716 = vmatpush3.msk.msra.mxu0 %vm328_vm11, %v766_v14  ;;  %vm320_vm11 = vcmp.eq.s32.totalorder %v284_v35, %v820_v10  ;;  %v282_v39 = vadd.s32 8, %v807_v1  ;;  %v297_v40 = vadd.s32 128, %v807_v1  ;;  %v489_v42 = vadd.f32 0.0001, %v488_v41 }
  0x1f   : > { %717 = vmatprep.subr.msk.mxu0 %vm343_vm12, %v766_v14  ;;  %vm335_vm12 = vcmp.eq.s32.totalorder %v299_v36, %v820_v10  ;;  %v498_v50 = vrot.slane %v487_v47, %v315_v3 }
  0x20   : > { %718 = vmatpush3.msk.msra.mxu0 %vm327_vm13, %v766_v14  ;;  %vm319_vm13 = vcmp.eq.s32.totalorder %v283_v37, %v820_v10  ;;  %756 = vrcp.f32 %v489_v42 }
  0x21   : > { %719 = vmatprep.subr.msk.mxu0 %vm342_vm14, %v766_v14  ;;  %vm334_vm14 = vcmp.eq.s32.totalorder %v298_v38, %v820_v10 }
  0x22   : > { %720 = vmatpush3.msk.msra.mxu0 %vm326_vm15, %v766_v14  ;;  %vm318_vm15 = vcmp.eq.s32.totalorder %v282_v39, %v820_v10 }
  0x23   : > { %721 = vmatprep.subr.msk.mxu0 %vm341_vm0, %v766_v14  ;;  %vm333_vm0 = vcmp.eq.s32.totalorder %v297_v40, %v820_v10 }
  0x24   : > { %722 = vmatpush3.msk.msra.mxu0 %vm325_vm1, %v766_v14  ;;  %vm317_vm1 = vcmp.eq.s32.totalorder %v807_v1, %v820_v10 }
  0x25   : > { %723 = vmatprep.subr.msk.mxu0 %vm340_vm2, %v766_v14  ;;  %vm501_vm2 = vcmask 60416  }
  0x26   : > { %724 = vmatpush3.msk.msra.mxu0 %vm324_vm3, %v766_v14  ;;  %vm515_vm3 = vcmask 57344  }
  0x27   : > { %725 = vmatprep.subr.msk.mxu0 %vm339_vm4, %v766_v14  ;;  %v516_v54 = vsel %vm515_vm3, %v487_v47, 0.0  ;;  %vm513_vm4 = vcmask 0  }
  0x28   : > { %726 = vmatpush3.msk.msra.mxu0 %vm323_vm5, %v766_v14 }
  0x29   : > { %727 = vmatprep.subr.msk.mxu0 %vm338_vm6, %v766_v14 }
  0x2a   : > { %728 = vmatpush3.msk.msra.mxu0 %vm322_vm7, %v766_v14 }
  0x2b   : > { %729 = vmatprep.subr.msk.mxu0 %vm337_vm8, %v766_v14 }
  0x2c   : > { %730 = vmatpush3.msk.msra.mxu0 %vm321_vm9, %v766_v14 }
  0x2d   : > { %731 = vmatprep.subr.msk.mxu0 %vm336_vm10, %v766_v14  ;;  %v757_v44 = vpop.eup %756 }
  0x2e   : > { %732 = vmatpush3.msk.msra.mxu0 %vm320_vm11, %v766_v14 }
  0x2f   : > { %733 = vmatprep.subr.msk.mxu0 %vm335_vm12, %v766_v14 }
  0x30   : > { %734 = vmatpush3.msk.msra.mxu0 %vm319_vm13, %v766_v14 }
  0x31   : > { %735 = vmatprep.subr.msk.mxu0 %vm334_vm14, %v766_v14 }
  0x32   : > { %736 = vmatpush3.msk.msra.mxu0 %vm318_vm15, %v766_v14 }
  0x33   : > { %737 = vmatprep.subr.msk.mxu0 %vm333_vm0, %v766_v14 }
  0x34   : > { %738 = vmatpush3.msk.msra.mxu0 %vm317_vm1, %v766_v14 }
  0x35   : > { %482 = vmatmul.mubr.f32.vlgmr.msra.gmra.mxu0 %v847_v20 }
  0xf5   : > { %v739_v43 = vpop.f32.mrf.mxu0 }
  0xf7   : > { %v740_v45 = vpop.f32.mrf.mxu0 }
  0xf8   : > { %v741_v46 = vadd.f32 %v740_v45, %v739_v43 }
  0xfa   : > { %v491_v48 = vmul.f32 %v757_v44, %v741_v46 }
  0xfc   : > { %v703_v49 = vadd.f32 -1.0, %v491_v48 }
  0xfe   : > { %v493_v51 = vand.u32 2147483647, %v703_v49 }
 0x100   : > { %v500_v52 = vmul.f32 %v498_v50, %v493_v51 }
 0x102   : > { %v502_v53 = vsel %vm501_vm2, %v500_v52, 0.0 }
 0x103   : > { %503 = vadd.xlane.f32.xlu0 %v502_v53 }
 0x107   : > { %517 = vadd.xlane.f32.xlu0 %v516_v54 }
 0x18c   : > { %v504_v55 = vpop.xlane.xlu0 %503 }
 0x18d   : > { %v505_v56 = vrot.slane %v504_v55, 4 }
 0x18f   : > { %v506_v57 = vadd.f32 %v505_v56, %v504_v55 }
 0x190   : > { %v518_v58 = vpop.xlane.xlu0 %517 }
 0x191   : > { %v507_v59 = vrot.slane %v506_v57, 2  ;;  %v519_v60 = vrot.slane %v518_v58, 4 }
 0x193   : > { %v520_v61 = vadd.f32 %v519_v60, %v518_v58  ;;  %v508_v62 = vadd.f32 %v507_v59, %v506_v57 }
 0x195   : > { %v521_v63 = vrot.slane %v520_v61, 2  ;;  %v509_v0 = vrot.slane %v508_v62, 1 }
 0x197   : > { %v522_v1 = vadd.f32 %v521_v63, %v520_v61  ;;  %v510_v2 = vadd.f32 %v509_v0, %v508_v62 }
 0x199   : > { %742 = vpush %v510_v2  ;;  %v523_v3 = vrot.slane %v522_v1, 1 }
 0x19b   : > { %v524_v4 = vadd.f32 %v523_v3, %v522_v1 }
 0x19d   : > { %744 = vpush %v524_v4 }
 0x1ca   : > { %s743_s12 = spop %742 }
 0x1cb   : > { %v512_v5 = vstv %s743_s12 }
 0x1cc   : > { %514 = vst.msk [vmem:[%s271_s11] sm:$0x1] %vm513_vm4, %v512_v5 }
 0x1ce   : > { %s745_s13 = spop %744 }
 0x1cf   : > { %s526_s17 = smul.f32 4.0, %s745_s13 }
 0x1d1   : > { %v527_v6 = vstv %s526_s17 }
 0x1d2   : > { %528 = vst.msk [vmem:[%s274_s16] sm:$0x1] %vm513_vm4, %v527_v6 }
 0x1d3 PF: > { %s16_s18 = sadd.s32 1, %s764_s18  }
 0x1d4   : > { %p13_p4 = scmp.ge.s32.totalorder %s16_s18, 4  }
 0x1d6   :  { %15 = sbr.rel (!%p13_p4) target bundleno = 1 (0x1), region = 87 }

</bundles_post_ra>
